<compile_context>
chip_gen: v5e
topology: v5e:2x2
jax: 0.10.0
libtpu: 0.0.40
codegen_flags: <defaults>
</compile_context>

<pallas_src>
import numpy as np
import jax
import jax.numpy as jnp
from jax.experimental import pallas as pl
from jax.experimental.pallas import tpu as pltpu
from jax.scipy.linalg import block_diag


def _round_up(v, m):
    return ((v + m - 1) // m) * m


# ---------------------------------------------------------------------------
# Kernel A: node-level projection, all heads fused into one wide matmul.
#   hx = x_tile @ W_stackedT + b_stacked
#   t  = hx @ W_att_blockdiag          (already scaled by 1/H)
# Weight blocks have constant index maps -> DMA'd once, resident across tiles.
# ---------------------------------------------------------------------------
def _node_proj_kernel(x_ref, wt_ref, b_ref, wa_ref, hx_ref, t_ref):
    hx = jnp.dot(x_ref[...], wt_ref[...],
                 preferred_element_type=jnp.float32) + b_ref[...]
    t = jnp.dot(hx, wa_ref[...], preferred_element_type=jnp.float32)
    hx_ref[...] = hx.astype(hx_ref.dtype)
    t_ref[...] = t.astype(t_ref.dtype)


# ---------------------------------------------------------------------------
# Kernel B: per-edge scoring on edge-major gathered operands.
#   score[e] = sum_k t_row[e, k] * hx_col[e, k]
# ---------------------------------------------------------------------------
def _edge_score_kernel(t_ref, c_ref, out_ref):
    prod = t_ref[...] * c_ref[...]
    out_ref[...] = jnp.sum(prod, axis=1, keepdims=True)


def _graph_attention_layer_impl(x, edge_index, w_heads, b_heads, w_att,
                                *, node_tile=512, edge_tile=2048):
    """
    x          : [N, in_f]          float32
    edge_index : [2, E]             int32
    w_heads    : [H, out_f, in_f]   float32  (nn.Linear weights)
    b_heads    : [H, out_f]         float32  (nn.Linear biases)
    w_att      : [H, out_f, out_f]  float32  (attention bilinear weights)
    returns    : [E]                float32
    """
    N, in_f = x.shape
    H, out_f, _ = w_heads.shape
    E = edge_index.shape[1]
    D = H * out_f

    # ---- host-side weight packing (tiny, done once, inside jit) -----------
    # Stacked linear weights:  [in_f, H*out_f] with column block h = W_h^T.
    w_stacked_t = jnp.transpose(w_heads, (2, 0, 1)).reshape(in_f, D)
    b_stacked = b_heads.reshape(1, D)
    # Block-diagonal attention weights with the head-mean (1/H) folded in.
    wa_bd = block_diag(*[w_att[h] for h in range(H)]) * (1.0 / H)
    wa_bd = wa_bd.astype(jnp.float32)

    # VMEM budget per pipeline buffer (conservative for v7x's 64 MiB VMEM).
    budget = 8 * 1024 * 1024

    # ---- node-level kernel (grid over node tiles) --------------------------
    max_tn = max(8, (budget // (2 * (in_f + 2 * D) * 4)) // 8 * 8)
    tN = min(node_tile, max_tn, _round_up(N, 8))
    N_pad = _round_up(N, tN)
    x_pad = x if N_pad == N else jnp.pad(x, ((0, N_pad - N), (0, 0)))

    hx, t_nodes = pl.pallas_call(
        _node_proj_kernel,
        out_shape=(jax.ShapeDtypeStruct((N_pad, D), jnp.float32),
                   jax.ShapeDtypeStruct((N_pad, D), jnp.float32)),
        grid_spec=pltpu.PrefetchScalarGridSpec(
            num_scalar_prefetch=0,
            grid=(N_pad // tN,),
            in_specs=[
                pl.BlockSpec((tN, in_f), lambda i: (i, 0)),   # x tile
                pl.BlockSpec((in_f, D), lambda i: (0, 0)),    # stacked W^T
                pl.BlockSpec((1, D), lambda i: (0, 0)),       # stacked bias
                pl.BlockSpec((D, D), lambda i: (0, 0)),       # blockdiag W_att/H
            ],
            out_specs=[
                pl.BlockSpec((tN, D), lambda i: (i, 0)),      # hx
                pl.BlockSpec((tN, D), lambda i: (i, 0)),      # t = hx @ Wa
            ],
        ),
        compiler_params=pltpu.CompilerParams(
            dimension_semantics=("parallel",)),
    )(x_pad, w_stacked_t, b_stacked, wa_bd)

    # ---- edge gather (XLA glue on small projected node tensors) ------------
    row = edge_index[0].astype(jnp.int32)
    col = edge_index[1].astype(jnp.int32)

    # 2 gathered f32 rows per edge + lane-padded output row in VMEM.
    bytes_per_edge = 2 * D * 4 + 128 * 4
    max_te = max(128, (budget // (2 * bytes_per_edge)) // 128 * 128)
    tE = min(edge_tile, max_te, _round_up(E, 128))
    E_pad = _round_up(E, tE)
    if E_pad != E:
        pad = jnp.zeros((E_pad - E,), jnp.int32)
        row = jnp.concatenate([row, pad])
        col = jnp.concatenate([col, pad])

    # Edge-major [E_pad, D]: contiguous row gather, no extra transpose pass.
    t_row = jnp.take(t_nodes, row, axis=0)    # [E_pad, D]
    hx_col = jnp.take(hx, col, axis=0)        # [E_pad, D]

    # ---- edge-scoring kernel (grid over edge tiles) -------------------------
    scores = pl.pallas_call(
        _edge_score_kernel,
        out_shape=jax.ShapeDtypeStruct((E_pad, 1), jnp.float32),
        grid_spec=pltpu.PrefetchScalarGridSpec(
            num_scalar_prefetch=0,
            grid=(E_pad // tE,),
            in_specs=[
                pl.BlockSpec((tE, D), lambda e: (e, 0)),
                pl.BlockSpec((tE, D), lambda e: (e, 0)),
            ],
            out_specs=pl.BlockSpec((tE, 1), lambda e: (e, 0)),
        ),
        compiler_params=pltpu.CompilerParams(
            dimension_semantics=("parallel",)),
    )(t_row, hx_col)

    return scores[:E, 0]


# Single jitted entry point: gathers + both pallas_calls compile together.
graph_attention_layer = jax.jit(_graph_attention_layer_impl,
                                static_argnames=("node_tile", "edge_tile"))


def _reference(x, edge_index, w_heads, b_heads, w_att):
    """Pure-JAX reference mirroring the PyTorch forward."""
    row, col = edge_index[0], edge_index[1]
    scores = []
    for h in range(w_heads.shape[0]):
        head_x = x @ w_heads[h].T + b_heads[h]
        a = head_x[row]
        c = head_x[col]
        s = jnp.sum((a @ w_att[h]) * c, axis=-1)   # diag(a @ W @ c^T)
        scores.append(s)
    return jnp.mean(jnp.stack(scores, axis=1), axis=1)


if __name__ == "__main__":
    # Small, deterministic setup.
    in_features = 16
    out_features = 32
    num_heads = 2
    N = 12       # nodes
    E = 8        # edges

    key = jax.random.PRNGKey(0)
    k_x, k_w, k_b, k_a, k_r, k_c = jax.random.split(key, 6)

    x = jax.random.normal(k_x, (N, in_features), dtype=jnp.float32)

    # nn.Linear-style params (deterministic synthetic init).
    w_heads = jax.random.uniform(
        k_w, (num_heads, out_features, in_features),
        minval=-0.25, maxval=0.25, dtype=jnp.float32)
    b_heads = jax.random.uniform(
        k_b, (num_heads, out_features),
        minval=-0.25, maxval=0.25, dtype=jnp.float32)

    # xavier_uniform(gain=1.414) for the attention bilinear weights.
    bound = 1.414 * np.sqrt(6.0 / (out_features + out_features))
    w_att = jax.random.uniform(
        k_a, (num_heads, out_features, out_features),
        minval=-bound, maxval=bound, dtype=jnp.float32)

    row = jax.random.randint(k_r, (E,), 0, N, dtype=jnp.int32)
    col = jax.random.randint(k_c, (E,), 0, N, dtype=jnp.int32)
    edge_index = jnp.stack([row, col], axis=0)   # [2, E]

    out = graph_attention_layer(x, edge_index, w_heads, b_heads, w_att)
    out = jax.block_until_ready(out)

    ref = _reference(x, edge_index, w_heads, b_heads, w_att)
    np.testing.assert_allclose(np.asarray(out), np.asarray(ref),
                               rtol=1e-5, atol=1e-5)

    print("KERNEL_OK")
</pallas_src>

<mosaic_0001>
module attributes {stable_mosaic.version = 11 : i64} {
  func.func @_node_proj_kernel(%arg0: i32, %arg1: memref<16x16xf32, #tpu.memory_space<vmem>>, %arg2: memref<16x64xf32, #tpu.memory_space<vmem>>, %arg3: memref<1x64xf32, #tpu.memory_space<vmem>>, %arg4: memref<64x64xf32, #tpu.memory_space<vmem>>, %arg5: memref<16x64xf32, #tpu.memory_space<vmem>>, %arg6: memref<16x64xf32, #tpu.memory_space<vmem>>) attributes {dimension_semantics = [#tpu.dimension_semantics<parallel>], iteration_bounds = array<i64: 1>, scalar_prefetch = 0 : i64, scratch_operands = 0 : i64, tpu.core_type = #tpu.core_type<tc>, window_params = [{transform_indices = @transform_0, window_bounds = array<i64: 16, 16>}, {pipeline_mode = #tpu.pipeline_mode<synchronous>, transform_indices = @transform_1, window_bounds = array<i64: 16, 64>}, {pipeline_mode = #tpu.pipeline_mode<synchronous>, transform_indices = @transform_2, window_bounds = array<i64: 1, 64>}, {pipeline_mode = #tpu.pipeline_mode<synchronous>, transform_indices = @transform_3, window_bounds = array<i64: 64, 64>}, {transform_indices = @transform_4, window_bounds = array<i64: 16, 64>}, {transform_indices = @transform_5, window_bounds = array<i64: 16, 64>}]} {
    %c0 = arith.constant 0 : index
    %c0_0 = arith.constant 0 : index
    %0 = vector.load %arg1[%c0, %c0_0] : memref<16x16xf32, #tpu.memory_space<vmem>>, vector<16x16xf32>
    %c0_1 = arith.constant 0 : index
    %c0_2 = arith.constant 0 : index
    %1 = vector.load %arg2[%c0_1, %c0_2] : memref<16x64xf32, #tpu.memory_space<vmem>>, vector<16x64xf32>
    %cst = arith.constant dense<0.000000e+00> : vector<16x64xf32>
    %2 = tpu.matmul %0, %1, %cst {dimension_numbers = #tpu.dot_dimension_numbers<[1], [0], [0], [1], [0, 0, 1, 1], [], []>} : vector<16x16xf32>, vector<16x64xf32>, vector<16x64xf32> -> vector<16x64xf32>
    %c0_3 = arith.constant 0 : index
    %c0_4 = arith.constant 0 : index
    %3 = vector.load %arg3[%c0_3, %c0_4] : memref<1x64xf32, #tpu.memory_space<vmem>>, vector<1x64xf32>
    %4 = vector.broadcast %3 : vector<1x64xf32> to vector<16x64xf32>
    %5 = arith.addf %2, %4 : vector<16x64xf32>
    %c0_5 = arith.constant 0 : index
    %c0_6 = arith.constant 0 : index
    %6 = vector.load %arg4[%c0_5, %c0_6] : memref<64x64xf32, #tpu.memory_space<vmem>>, vector<64x64xf32>
    %cst_7 = arith.constant dense<0.000000e+00> : vector<16x64xf32>
    %7 = tpu.matmul %5, %6, %cst_7 {dimension_numbers = #tpu.dot_dimension_numbers<[1], [0], [0], [1], [0, 0, 1, 1], [], []>} : vector<16x64xf32>, vector<64x64xf32>, vector<16x64xf32> -> vector<16x64xf32>
    %c0_8 = arith.constant 0 : index
    %c0_9 = arith.constant 0 : index
    %8 = vector.load %arg5[%c0_8, %c0_9] : memref<16x64xf32, #tpu.memory_space<vmem>>, vector<16x64xf32>
    tpu.vector_store %arg5[%c0_8, %c0_9], %5 {strides = array<i32>} : memref<16x64xf32, #tpu.memory_space<vmem>>, vector<16x64xf32>,
    %c0_10 = arith.constant 0 : index
    %c0_11 = arith.constant 0 : index
    %9 = vector.load %arg6[%c0_10, %c0_11] : memref<16x64xf32, #tpu.memory_space<vmem>>, vector<16x64xf32>
    tpu.vector_store %arg6[%c0_10, %c0_11], %7 {strides = array<i32>} : memref<16x64xf32, #tpu.memory_space<vmem>>, vector<16x64xf32>,
    return
  }
  func.func @transform_0(%arg0: i32) -> (i32, i32) {
    %c0_i32 = arith.constant 0 : i32
    %c0_i32_0 = arith.constant 0 : i32
    return %arg0, %c0_i32 : i32, i32
  }
  func.func @transform_1(%arg0: i32) -> (i32, i32) {
    %c0_i32 = arith.constant 0 : i32
    %c0_i32_0 = arith.constant 0 : i32
    %c0_i32_1 = arith.constant 0 : i32
    return %c0_i32, %c0_i32_0 : i32, i32
  }
  func.func @transform_2(%arg0: i32) -> (i32, i32) {
    %c0_i32 = arith.constant 0 : i32
    %c0_i32_0 = arith.constant 0 : i32
    %c0_i32_1 = arith.constant 0 : i32
    return %c0_i32, %c0_i32_0 : i32, i32
  }
  func.func @transform_3(%arg0: i32) -> (i32, i32) {
    %c0_i32 = arith.constant 0 : i32
    %c0_i32_0 = arith.constant 0 : i32
    %c0_i32_1 = arith.constant 0 : i32
    return %c0_i32, %c0_i32_0 : i32, i32
  }
  func.func @transform_4(%arg0: i32) -> (i32, i32) {
    %c0_i32 = arith.constant 0 : i32
    %c0_i32_0 = arith.constant 0 : i32
    return %arg0, %c0_i32 : i32, i32
  }
  func.func @transform_5(%arg0: i32) -> (i32, i32) {
    %c0_i32 = arith.constant 0 : i32
    %c0_i32_0 = arith.constant 0 : i32
    return %arg0, %c0_i32 : i32, i32
  }
}

module attributes {stable_mosaic.version = 11 : i64} {
  func.func @_edge_score_kernel(%arg0: i32, %arg1: memref<128x64xf32, #tpu.memory_space<vmem>>, %arg2: memref<128x64xf32, #tpu.memory_space<vmem>>, %arg3: memref<128x1xf32, #tpu.memory_space<vmem>>) attributes {dimension_semantics = [#tpu.dimension_semantics<parallel>], iteration_bounds = array<i64: 1>, scalar_prefetch = 0 : i64, scratch_operands = 0 : i64, tpu.core_type = #tpu.core_type<tc>, window_params = [{transform_indices = @transform_0, window_bounds = array<i64: 128, 64>}, {transform_indices = @transform_1, window_bounds = array<i64: 128, 64>}, {transform_indices = @transform_2, window_bounds = array<i64: 128, 1>}]} {
    %c0 = arith.constant 0 : index
    %c0_0 = arith.constant 0 : index
    %0 = vector.load %arg1[%c0, %c0_0] : memref<128x64xf32, #tpu.memory_space<vmem>>, vector<128x64xf32>
    %c0_1 = arith.constant 0 : index
    %c0_2 = arith.constant 0 : index
    %1 = vector.load %arg2[%c0_1, %c0_2] : memref<128x64xf32, #tpu.memory_space<vmem>>, vector<128x64xf32>
    %2 = arith.mulf %0, %1 : vector<128x64xf32>
    %cst = arith.constant dense<0.000000e+00> : vector<128xf32>
    %3 = vector.multi_reduction <add>, %2, %cst [1] : vector<128x64xf32> to vector<128xf32>
    %4 = vector.shape_cast %3 : vector<128xf32> to vector<128x1xf32>
    %c0_3 = arith.constant 0 : index
    %c0_4 = arith.constant 0 : index
    %5 = vector.load %arg3[%c0_3, %c0_4] : memref<128x1xf32, #tpu.memory_space<vmem>>, vector<128x1xf32>
    tpu.vector_store %arg3[%c0_3, %c0_4], %4 {strides = array<i32>} : memref<128x1xf32, #tpu.memory_space<vmem>>, vector<128x1xf32>,
    return
  }
  func.func @transform_0(%arg0: i32) -> (i32, i32) {
    %c0_i32 = arith.constant 0 : i32
    %c0_i32_0 = arith.constant 0 : i32
    return %arg0, %c0_i32 : i32, i32
  }
  func.func @transform_1(%arg0: i32) -> (i32, i32) {
    %c0_i32 = arith.constant 0 : i32
    %c0_i32_0 = arith.constant 0 : i32
    return %arg0, %c0_i32 : i32, i32
  }
  func.func @transform_2(%arg0: i32) -> (i32, i32) {
    %c0_i32 = arith.constant 0 : i32
    %c0_i32_0 = arith.constant 0 : i32
    return %arg0, %c0_i32 : i32, i32
  }
}

</mosaic_0001>

<bundles_post_ra>
// kernel: _graph_attention_layer_impl.3
= control target key start
LH: loop header
LB: loop body
LE: loop exit
PB: predicated region body
PF: predicated region fallthrough
CT: control target
= control target key end

     0   :  { %vm59_vm0 = vcmask 523264   ;;  %vm108_vm1 = vcmask 7168   ;;  %s320_s0 = inlined_call_operand.vmem [shape: f32[128,64], index: 0, kind: input, shape index: {}]   ;;  %s321_s1 = inlined_call_operand.vmem [shape: f32[128,64], index: 1, kind: input, shape index: {}]   ;;  %s322_s2 = inlined_call_operand.vmem [shape: f32[128,1], index: 2, kind: output, shape index: {}]  }
   0x1   :  { %v11_v0 = vld [vmem:[%s320_s0] sm:$0xff]  ;;  %v13_v5 = vld [vmem:[%s320_s0 + $0x10] sm:$0xff]  ;;  %v12_v9 = vld [vmem:[%s320_s0 + $0x8] sm:$0xff] }
   0x2   :  { %v27_v1 = vld [vmem:[%s321_s1] sm:$0xff]  ;;  %v29_v6 = vld [vmem:[%s321_s1 + $0x10] sm:$0xff]  ;;  %v28_v10 = vld [vmem:[%s321_s1 + $0x8] sm:$0xff] }
   0x3   :  { %v15_v2 = vld [vmem:[%s320_s0 + $0x20] sm:$0xff]  ;;  %v43_v3 = vmul.f32 %v27_v1, %v11_v0  ;;  %v45_v8 = vmul.f32 %v29_v6, %v13_v5  ;;  %v16_v11 = vld [vmem:[%s320_s0 + $0x28] sm:$0xff]  ;;  %v14_v14 = vld [vmem:[%s320_s0 + $0x18] sm:$0xff]  ;;  %v44_v18 = vmul.f32 %v28_v10, %v12_v9 }
   0x4   :  { %v31_v4 = vld [vmem:[%s321_s1 + $0x20] sm:$0xff]  ;;  %v32_v13 = vld [vmem:[%s321_s1 + $0x28] sm:$0xff]  ;;  %v30_v15 = vld [vmem:[%s321_s1 + $0x18] sm:$0xff] }
   0x5   :  { %v47_v7 = vmul.f32 %v31_v4, %v15_v2  ;;  %v60_v12 = vsel %vm59_vm0, %v43_v3, 0.0  ;;  %v66_v17 = vsel %vm59_vm0, %v45_v8, 0.0  ;;  %v48_v19 = vmul.f32 %v32_v13, %v16_v11  ;;  %v17_v24 = vld [vmem:[%s320_s0 + $0x30] sm:$0xff]  ;;  %v19_v26 = vld [vmem:[%s320_s0 + $0x40] sm:$0xff]  ;;  %v18_v28 = vld [vmem:[%s320_s0 + $0x38] sm:$0xff] }
   0x6   :  { %61 = vadd.xlane.f32.xlu0 %v60_v12  ;;  %67 = vadd.xlane.f32.xlu1 %v66_v17  ;;  %v46_v20 = vmul.f32 %v30_v15, %v14_v14  ;;  %v63_v21 = vsel %vm59_vm0, %v44_v18, 0.0  ;;  %v33_v25 = vld [vmem:[%s321_s1 + $0x30] sm:$0xff]  ;;  %v35_v27 = vld [vmem:[%s321_s1 + $0x40] sm:$0xff]  ;;  %v34_v29 = vld [vmem:[%s321_s1 + $0x38] sm:$0xff] }
   0x7   :  { %v72_v16 = vsel %vm59_vm0, %v47_v7, 0.0  ;;  %v75_v22 = vsel %vm59_vm0, %v48_v19, 0.0  ;;  %v49_v30 = vmul.f32 %v33_v25, %v17_v24  ;;  %v51_v31 = vmul.f32 %v35_v27, %v19_v26  ;;  %v20_v36 = vld [vmem:[%s320_s0 + $0x48] sm:$0xff]  ;;  %v22_v38 = vld [vmem:[%s320_s0 + $0x58] sm:$0xff]  ;;  %v21_v40 = vld [vmem:[%s320_s0 + $0x50] sm:$0xff] }
   0x8   :  { %73 = vadd.xlane.f32.xlu2 %v72_v16  ;;  %v69_v23 = vsel %vm59_vm0, %v46_v20, 0.0  ;;  %v50_v32 = vmul.f32 %v34_v29, %v18_v28  ;;  %v36_v37 = vld [vmem:[%s321_s1 + $0x48] sm:$0xff]  ;;  %v38_v39 = vld [vmem:[%s321_s1 + $0x58] sm:$0xff]  ;;  %v37_v41 = vld [vmem:[%s321_s1 + $0x50] sm:$0xff] }
   0x9   :  { %v78_v33 = vsel %vm59_vm0, %v49_v30, 0.0  ;;  %v84_v34 = vsel %vm59_vm0, %v51_v31, 0.0  ;;  %v52_v42 = vmul.f32 %v36_v37, %v20_v36  ;;  %v54_v43 = vmul.f32 %v38_v39, %v22_v38  ;;  %v23_v48 = vld [vmem:[%s320_s0 + $0x60] sm:$0xff]  ;;  %v25_v50 = vld [vmem:[%s320_s0 + $0x70] sm:$0xff]  ;;  %v24_v52 = vld [vmem:[%s320_s0 + $0x68] sm:$0xff] }
   0xa   :  { %v81_v35 = vsel %vm59_vm0, %v50_v32, 0.0  ;;  %v53_v44 = vmul.f32 %v37_v41, %v21_v40  ;;  %v39_v49 = vld [vmem:[%s321_s1 + $0x60] sm:$0xff]  ;;  %v41_v51 = vld [vmem:[%s321_s1 + $0x70] sm:$0xff]  ;;  %v40_v53 = vld [vmem:[%s321_s1 + $0x68] sm:$0xff] }
   0xb   :  { %v87_v45 = vsel %vm59_vm0, %v52_v42, 0.0  ;;  %v93_v46 = vsel %vm59_vm0, %v54_v43, 0.0  ;;  %v55_v54 = vmul.f32 %v39_v49, %v23_v48  ;;  %v57_v55 = vmul.f32 %v41_v51, %v25_v50  ;;  %v26_v60 = vld [vmem:[%s320_s0 + $0x78] sm:$0xff] }
   0xc   :  { %v90_v47 = vsel %vm59_vm0, %v53_v44, 0.0  ;;  %v56_v56 = vmul.f32 %v40_v53, %v24_v52  ;;  %v42_v61 = vld [vmem:[%s321_s1 + $0x78] sm:$0xff] }
   0xd   :  { %v96_v57 = vsel %vm59_vm0, %v55_v54, 0.0  ;;  %v102_v58 = vsel %vm59_vm0, %v57_v55, 0.0  ;;  %v58_v62 = vmul.f32 %v42_v61, %v26_v60 }
   0xe   :  { %64 = vadd.xlane.f32.xlu0 %v63_v21  ;;  %70 = vadd.xlane.f32.xlu1 %v69_v23  ;;  %v99_v59 = vsel %vm59_vm0, %v56_v56, 0.0 }
   0xf   :  { %v105_v63 = vsel %vm59_vm0, %v58_v62, 0.0 }
  0x10   :  { %76 = vadd.xlane.f32.xlu2 %v75_v22 }
  0x16   :  { %79 = vadd.xlane.f32.xlu0 %v78_v33  ;;  %82 = vadd.xlane.f32.xlu1 %v81_v35 }
  0x18   :  { %85 = vadd.xlane.f32.xlu2 %v84_v34 }
  0x1e   :  { %88 = vadd.xlane.f32.xlu0 %v87_v45  ;;  %91 = vadd.xlane.f32.xlu1 %v90_v47 }
  0x20   :  { %94 = vadd.xlane.f32.xlu2 %v93_v46 }
  0x26   :  { %97 = vadd.xlane.f32.xlu0 %v96_v57  ;;  %100 = vadd.xlane.f32.xlu1 %v99_v59 }
  0x28   :  { %103 = vadd.xlane.f32.xlu2 %v102_v58 }
  0x2e   :  { %106 = vadd.xlane.f32.xlu0 %v105_v63 }
  0x79   :  { %v62_v0 = vpop.xlane.xlu0 %61  ;;  %v68_v2 = vpop.xlane.xlu1 %67 }
  0x7a   :  { %109 = vst.msk [vmem:[%s322_s2] sm:$0xff] %vm108_vm1, %v62_v0 }
  0x7b   :  { %v74_v1 = vpop.xlane.xlu2 %73  ;;  %111 = vst.msk [vmem:[%s322_s2 + $0x10] sm:$0xff] %vm108_vm1, %v68_v2 }
  0x7c   :  { %113 = vst.msk [vmem:[%s322_s2 + $0x20] sm:$0xff] %vm108_vm1, %v74_v1 }
  0x81   :  { %v65_v3 = vpop.xlane.xlu0 %64  ;;  %v71_v5 = vpop.xlane.xlu1 %70 }
  0x82   :  { %110 = vst.msk [vmem:[%s322_s2 + $0x8] sm:$0xff] %vm108_vm1, %v65_v3 }
  0x83   :  { %v77_v4 = vpop.xlane.xlu2 %76  ;;  %112 = vst.msk [vmem:[%s322_s2 + $0x18] sm:$0xff] %vm108_vm1, %v71_v5 }
  0x84   :  { %114 = vst.msk [vmem:[%s322_s2 + $0x28] sm:$0xff] %vm108_vm1, %v77_v4 }
  0x89   :  { %v80_v6 = vpop.xlane.xlu0 %79  ;;  %v83_v8 = vpop.xlane.xlu1 %82 }
  0x8a   :  { %115 = vst.msk [vmem:[%s322_s2 + $0x30] sm:$0xff] %vm108_vm1, %v80_v6 }
  0x8b   :  { %v86_v7 = vpop.xlane.xlu2 %85  ;;  %116 = vst.msk [vmem:[%s322_s2 + $0x38] sm:$0xff] %vm108_vm1, %v83_v8 }
  0x8c   :  { %117 = vst.msk [vmem:[%s322_s2 + $0x40] sm:$0xff] %vm108_vm1, %v86_v7 }
  0x91   :  { %v89_v9 = vpop.xlane.xlu0 %88  ;;  %v92_v11 = vpop.xlane.xlu1 %91 }
  0x92   :  { %118 = vst.msk [vmem:[%s322_s2 + $0x48] sm:$0xff] %vm108_vm1, %v89_v9 }
  0x93   :  { %v95_v10 = vpop.xlane.xlu2 %94  ;;  %119 = vst.msk [vmem:[%s322_s2 + $0x50] sm:$0xff] %vm108_vm1, %v92_v11 }
  0x94   :  { %120 = vst.msk [vmem:[%s322_s2 + $0x58] sm:$0xff] %vm108_vm1, %v95_v10 }
  0x99   :  { %v98_v12 = vpop.xlane.xlu0 %97  ;;  %v101_v14 = vpop.xlane.xlu1 %100 }
  0x9a   :  { %121 = vst.msk [vmem:[%s322_s2 + $0x60] sm:$0xff] %vm108_vm1, %v98_v12 }
  0x9b   :  { %v104_v13 = vpop.xlane.xlu2 %103  ;;  %122 = vst.msk [vmem:[%s322_s2 + $0x68] sm:$0xff] %vm108_vm1, %v101_v14 }
  0x9c   :  { %123 = vst.msk [vmem:[%s322_s2 + $0x70] sm:$0xff] %vm108_vm1, %v104_v13 }
  0xa1   :  { %v107_v15 = vpop.xlane.xlu0 %106 }
  0xa2   :  { %124 = vst.msk [vmem:[%s322_s2 + $0x78] sm:$0xff] %vm108_vm1, %v107_v15 }

// kernel: _graph_attention_layer_impl.2
= control target key start
LH: loop header
LB: loop body
LE: loop exit
PB: predicated region body
PF: predicated region fallthrough
CT: control target
= control target key end

     0   :  { %vm27_vm0 = vcmask 130048   ;;  %vm65_vm1 = vcmask 523264   ;;  %s203_s1 = inlined_call_operand.vmem [shape: f32[16,64], index: 1, kind: input, shape index: {}]   ;;  %s204_s0 = inlined_call_operand.vmem [shape: f32[16,16], index: 0, kind: input, shape index: {}]   ;;  %s205_s3 = inlined_call_operand.vmem [shape: f32[64,64], index: 3, kind: input, shape index: {}]   ;;  %s206_s2 = inlined_call_operand.vmem [shape: f32[1,64], index: 2, kind: input, shape index: {}]   ;;  %s207_s4 = inlined_call_operand.vmem [shape: f32[16,64], index: 4, kind: output, shape index: {0}]   ;;  %s208_s5 = inlined_call_operand.vmem [shape: f32[16,64], index: 5, kind: output, shape index: {1}]  }
   0x1   :  { %v22_v0 = vld [vmem:[%s203_s1 + $0x8] sm:$0xff]  ;;  %v21_v1 = vld [vmem:[%s203_s1] sm:$0xff]  ;;  %v64_v3 = vld [vmem:[%s205_s3 + $0x38] sm:$0xff] }
   0x2   :  { %48 = vmatpush.msra.mxu0 %v22_v0  ;;  %v19_v2 = vld [vmem:[%s204_s0] sm:$0xff]  ;;  %v63_v4 = vld [vmem:[%s205_s3 + $0x30] sm:$0xff]  ;;  %80 = vmatpush.msra.mxu1 %v64_v3  ;;  %v62_v5 = vld [vmem:[%s205_s3 + $0x28] sm:$0xff] }
   0x3   :  { %111 = vmatpush.msra.mxu2 %v64_v3  ;;  %v61_v6 = vld [vmem:[%s205_s3 + $0x20] sm:$0xff]  ;;  %v60_v7 = vld [vmem:[%s205_s3 + $0x18] sm:$0xff]  ;;  %v20_v8 = vld [vmem:[%s204_s0 + $0x8] sm:$0xff] }
   0x4   :  { %49 = vmatpush.msra.mxu0 %v21_v1  ;;  %81 = vmatpush.msra.mxu1 %v63_v4  ;;  %v59_v9 = vld [vmem:[%s205_s3 + $0x10] sm:$0xff]  ;;  %v58_v10 = vld [vmem:[%s205_s3 + $0x8] sm:$0xff]  ;;  %v57_v11 = vld [vmem:[%s205_s3] sm:$0xff] }
   0x5   :  { %107 = vmatmul.msk.f32.vlgmr.msra.gmra.mxu0 %vm27_vm0, %v19_v2  ;;  %112 = vmatpush.msra.mxu2 %v63_v4  ;;  %v119_v12 = vld [vmem:[%s206_s2] ss:$0 sm:$0xff] }
   0x6   :  { %82 = vmatpush.msra.mxu1 %v62_v5 }
   0x7   :  { %113 = vmatpush.msra.mxu2 %v62_v5 }
   0x8   :  { %83 = vmatpush.msra.mxu1 %v61_v6 }
   0x9   :  { %114 = vmatpush.msra.mxu2 %v61_v6 }
   0xa   :  { %84 = vmatpush.msra.mxu1 %v60_v7 }
   0xb   :  { %115 = vmatpush.msra.mxu2 %v60_v7 }
   0xc   :  { %85 = vmatpush.msra.mxu1 %v59_v9 }
   0xd   :  { %108 = vmatmul.msk.f32.gmra.mxu0 %vm27_vm0, %v20_v8  ;;  %116 = vmatpush.msra.mxu2 %v59_v9 }
   0xe   :  { %86 = vmatpush.msra.mxu1 %v58_v10 }
   0xf   :  { %117 = vmatpush.msra.mxu2 %v58_v10 }
  0x10   :  { %87 = vmatpush.msra.mxu1 %v57_v11 }
  0x11   :  { %118 = vmatpush.msra.mxu2 %v57_v11 }
  0x82   :  { %v51_v13 = vpop.f32.mrf.mxu0 }
  0x83   :  { %v52_v14 = vadd.f32 %v119_v12, %v51_v13 }
  0x85   :  { %95 = vst.msk [vmem:[%s207_s4] sm:$0xff] %vm65_vm1, %v52_v14  ;;  %109 = vmatmul.msk.f32.vlgmr.msra.gmra.mxu1 %vm65_vm1, %v52_v14 }
  0x8a   :  { %v54_v15 = vpop.f32.mrf.mxu0 }
  0x8b   :  { %v55_v16 = vadd.f32 %v119_v12, %v54_v15 }
  0x8d   :  { %96 = vst.msk [vmem:[%s207_s4 + $0x8] sm:$0xff] %vm65_vm1, %v55_v16  ;;  %110 = vmatmul.msk.f32.vlgmr.msra.gmra.mxu2 %vm65_vm1, %v55_v16 }
 0x102   :  { %v89_v17 = vpop.f32.mrf.mxu1 }
 0x103   :  { %97 = vst.msk [vmem:[%s208_s5] sm:$0xff] %vm65_vm1, %v89_v17 }
 0x110   :  { %v92_v18 = vpop.f32.mrf.mxu2 }
 0x111   :  { %98 = vst.msk [vmem:[%s208_s5 + $0x8] sm:$0xff] %vm65_vm1, %v92_v18 }

</bundles_post_ra>
